<compile_context>
chip_gen: v5e
topology: v5e:2x2
jax: 0.10.0
libtpu: 0.0.40
codegen_flags: <defaults>
</compile_context>

<pallas_src>
import jax
import jax.numpy as jnp
import numpy as np
from jax.experimental import pallas as pl
from jax.experimental.pallas import tpu as pltpu

# ----- problem sizes (small, deterministic) -----
B = 8          # batch == nsamples (full-batch, as required for mu * penalties broadcast)
D = 32         # feature dim
NE = 16        # number of equality constraints
NI = 16        # number of inequality constraints
NC = NE + NI   # total constraints

# ----- synthetic objective / constraint weights (deterministic) -----
W_OBJ = 1.0
W_EQ = 2.0
W_IN = 3.0

# scalar output slot names (kernel writes these indices of the SMEM scalar vector)
SCALAR_NAMES = [
    "objective_loss",                 # 0
    "penalty_loss",                   # 1  (scaled)
    "unscaled_penalty_loss",          # 2
    "2norm_unscaled_penalty_loss",    # 3
    "mu_scaled_penalty_loss",         # 4
    "con_lagrangian",                 # 5
    "loss",                           # 6  (training-mode loss)
    "scaled_performance",             # 7  (== eval-mode loss)
    "mu",                             # 8  (mean of mu buffer)
]


def aug_lagrange_kernel(x_ref, y_ref, a_ref, b_ref, lm_ref, mu_ref,
                        c_val_ref, c_viol_ref, scalars_ref):
    x = x_ref[...]
    y = y_ref[...]
    lm = lm_ref[...]              # (B, NC)  Lagrange multipliers
    mu = mu_ref[...]              # (B, 1)   mu buffer

    # ---- objective residual ----
    diff = x - y

    # ---- single fused constraint matmul: C = x @ [A_eq | A_in] - [b_eq | b_in] ----
    c = jnp.dot(x, a_ref[...], preferred_element_type=jnp.float32) - b_ref[...]

    # ---- violations in one shot: |C| for eq columns, relu(C) for ineq columns ----
    col_idx = jax.lax.broadcasted_iota(jnp.int32, (B, NC), 1)
    is_eq = col_idx < NE
    relu_c = jnp.maximum(c, 0.0)
    v = jnp.where(is_eq, jnp.abs(c), relu_c)
    v2 = v * v

    # ---- full-tile stores (no partial-lane column writes) ----
    c_val_ref[...] = c
    c_viol_ref[...] = v

    # per-column weights give the scaled penalty loss from one reduce;
    # exact for any NE/NI since each group keeps its own mean denominator.
    # (Python-float scalars only -> nothing is captured as an array constant.)
    w_col = jnp.where(is_eq, W_EQ / (B * NE), W_IN / (B * NI))

    row_pen = jnp.sum(v2, axis=-1, keepdims=True)          # penalties per row (B, 1)

    # ---- scalar epilogue (all scale factors are Python floats) ----
    fx = jnp.sum(diff * diff) * (W_OBJ / (B * D))           # objective_loss
    penalty_loss = jnp.sum(v2 * w_col)                      # scaled penalty loss
    unscaled_penalty = jnp.sum(row_pen) * (1.0 / B)
    two_norm_penalty = jnp.sum(jnp.sqrt(row_pen)) * (1.0 / B)
    mu_scaled = jnp.sum(mu * row_pen) * (1.0 / B)
    con_lagr = jnp.sum(lm * relu_c) * (1.0 / B)
    mu_mean = jnp.sum(mu) * (1.0 / B)

    scalars_ref[0] = fx
    scalars_ref[1] = penalty_loss
    scalars_ref[2] = unscaled_penalty
    scalars_ref[3] = two_norm_penalty
    scalars_ref[4] = mu_scaled
    scalars_ref[5] = con_lagr
    scalars_ref[6] = fx + con_lagr + mu_scaled     # training-mode loss
    scalars_ref[7] = fx + penalty_loss             # scaled_performance (== eval-mode loss)
    scalars_ref[8] = mu_mean


def augmented_lagrange_forward(x, y, a_eq, b_eq, a_in, b_in, lm, mu):
    # Fuse constraint parameters so the kernel does a single matmul and a single
    # full-tile store per constraint output.
    a = jnp.concatenate([a_eq, a_in], axis=-1)            # (D, NC)
    b = jnp.concatenate([b_eq, b_in], axis=-1)            # (1, NC)

    vmem = pl.BlockSpec(memory_space=pltpu.MemorySpace.VMEM)
    smem = pl.BlockSpec(memory_space=pltpu.MemorySpace.SMEM)

    cost = pl.CostEstimate(
        flops=2 * B * D * NC + 12 * B * NC,
        transcendentals=B,                                 # sqrt per row
        bytes_accessed=4 * (2 * B * D + D * NC + NC + B * NC + B + 2 * B * NC + 9),
    )

    c_values, c_violations, scalars = pl.pallas_call(
        aug_lagrange_kernel,
        out_shape=(
            jax.ShapeDtypeStruct((B, NC), jnp.float32),    # C_values
            jax.ShapeDtypeStruct((B, NC), jnp.float32),    # C_violations
            jax.ShapeDtypeStruct((9,), jnp.float32),       # 9 scalar outputs (all written)
        ),
        in_specs=[vmem] * 6,
        out_specs=(vmem, vmem, smem),
        cost_estimate=cost,
    )(x, y, a, b, lm, mu)

    out = {name: scalars[i] for i, name in enumerate(SCALAR_NAMES)}
    out["C_values"] = c_values
    out["C_violations"] = c_violations
    # equality flags are [True]*NE + [False]*NI -> static column splits (glue, not hot path)
    out["C_eq_values"] = c_values[:, :NE]
    out["C_ineq_values"] = c_values[:, NE:]
    out["C_eq_violations"] = c_violations[:, :NE]
    out["C_ineq_violations"] = c_violations[:, NE:]
    return out


def reference_forward(x, y, a_eq, b_eq, a_in, b_in, lm, mu):
    """Pure-JAX reference mirroring the torch forward (training mode, epoch=0 path)."""
    diff = x - y
    fx = W_OBJ * jnp.mean(diff ** 2)
    g = x @ a_eq - b_eq
    h = x @ a_in - b_in
    viol_eq = jnp.abs(g)
    viol_in = jnp.maximum(h, 0.0)
    penalty_loss = W_EQ * jnp.mean(viol_eq ** 2) + W_IN * jnp.mean(viol_in ** 2)
    C = jnp.concatenate([g, h], axis=-1)
    V = jnp.concatenate([viol_eq, viol_in], axis=-1)
    penalties = jnp.sum(V ** 2, axis=-1, keepdims=True)
    penalties_sqrt = jnp.sqrt(penalties)
    mu_scaled = jnp.mean(mu * penalties)
    con_lagr = jnp.mean(jnp.sum(lm * jnp.maximum(C, 0.0), axis=-1))
    return {
        "objective_loss": fx,
        "penalty_loss": penalty_loss,
        "unscaled_penalty_loss": jnp.mean(penalties),
        "2norm_unscaled_penalty_loss": jnp.mean(penalties_sqrt),
        "mu_scaled_penalty_loss": mu_scaled,
        "con_lagrangian": con_lagr,
        "loss": fx + con_lagr + mu_scaled,
        "scaled_performance": fx + penalty_loss,
        "mu": jnp.mean(mu),
        "C_values": C,
        "C_violations": V,
    }


if __name__ == "__main__":
    key = jax.random.PRNGKey(0)
    k_x, k_y, k_aeq, k_beq, k_ain, k_bin, k_lm = jax.random.split(key, 7)

    x = jax.random.normal(k_x, (B, D), dtype=jnp.float32)
    y = jax.random.normal(k_y, (B, D), dtype=jnp.float32)

    # deterministic synthetic constraint parameters
    a_eq = 0.1 * jax.random.normal(k_aeq, (D, NE), dtype=jnp.float32)
    b_eq = 0.1 * jax.random.normal(k_beq, (1, NE), dtype=jnp.float32)
    a_in = 0.1 * jax.random.normal(k_ain, (D, NI), dtype=jnp.float32)
    b_in = 0.1 * jax.random.normal(k_bin, (1, NI), dtype=jnp.float32)

    # buffers: mu = mu_init * ones(nsamples, 1); lm initialized at first training call
    # (zeros). Here we use small deterministic nonzero lm to exercise the bmm path
    # (represents multiplier state after some outer-loop updates).
    mu_init = 0.001
    mu = mu_init * jnp.ones((B, 1), dtype=jnp.float32)
    lm = 0.05 * jnp.abs(jax.random.normal(k_lm, (B, NC), dtype=jnp.float32))

    out = augmented_lagrange_forward(x, y, a_eq, b_eq, a_in, b_in, lm, mu)
    jax.block_until_ready(out)

    ref = reference_forward(x, y, a_eq, b_eq, a_in, b_in, lm, mu)
    for name in SCALAR_NAMES + ["C_values", "C_violations"]:
        np.testing.assert_allclose(np.asarray(out[name]), np.asarray(ref[name]),
                                   rtol=1e-5, atol=1e-5)

    print("KERNEL_OK")
</pallas_src>

<mosaic_0001>
module attributes {stable_mosaic.version = 11 : i64} {
  func.func @aug_lagrange_kernel(%arg0: memref<8x32xf32, #tpu.memory_space<vmem>>, %arg1: memref<8x32xf32, #tpu.memory_space<vmem>>, %arg2: memref<32x32xf32, #tpu.memory_space<vmem>>, %arg3: memref<1x32xf32, #tpu.memory_space<vmem>>, %arg4: memref<8x32xf32, #tpu.memory_space<vmem>>, %arg5: memref<8x1xf32, #tpu.memory_space<vmem>>, %arg6: memref<8x32xf32, #tpu.memory_space<vmem>>, %arg7: memref<8x32xf32, #tpu.memory_space<vmem>>, %arg8: memref<9xf32, #tpu.memory_space<smem>>) attributes {dimension_semantics = [], scalar_prefetch = 0 : i64, scratch_operands = 0 : i64, tpu.core_type = #tpu.core_type<tc>} {
    %c0 = arith.constant 0 : index
    %c0_0 = arith.constant 0 : index
    %0 = vector.load %arg0[%c0, %c0_0] : memref<8x32xf32, #tpu.memory_space<vmem>>, vector<8x32xf32>
    %c0_1 = arith.constant 0 : index
    %c0_2 = arith.constant 0 : index
    %1 = vector.load %arg1[%c0_1, %c0_2] : memref<8x32xf32, #tpu.memory_space<vmem>>, vector<8x32xf32>
    %c0_3 = arith.constant 0 : index
    %c0_4 = arith.constant 0 : index
    %2 = vector.load %arg4[%c0_3, %c0_4] : memref<8x32xf32, #tpu.memory_space<vmem>>, vector<8x32xf32>
    %c0_5 = arith.constant 0 : index
    %c0_6 = arith.constant 0 : index
    %3 = vector.load %arg5[%c0_5, %c0_6] : memref<8x1xf32, #tpu.memory_space<vmem>>, vector<8x1xf32>
    %4 = arith.subf %0, %1 : vector<8x32xf32>
    %c0_7 = arith.constant 0 : index
    %c0_8 = arith.constant 0 : index
    %5 = vector.load %arg2[%c0_7, %c0_8] : memref<32x32xf32, #tpu.memory_space<vmem>>, vector<32x32xf32>
    %cst = arith.constant dense<0.000000e+00> : vector<8x32xf32>
    %6 = tpu.matmul %0, %5, %cst {dimension_numbers = #tpu.dot_dimension_numbers<[1], [0], [0], [1], [0, 0, 1, 1], [], []>} : vector<8x32xf32>, vector<32x32xf32>, vector<8x32xf32> -> vector<8x32xf32>
    %c0_9 = arith.constant 0 : index
    %c0_10 = arith.constant 0 : index
    %7 = vector.load %arg3[%c0_9, %c0_10] : memref<1x32xf32, #tpu.memory_space<vmem>>, vector<1x32xf32>
    %8 = vector.broadcast %7 : vector<1x32xf32> to vector<8x32xf32>
    %9 = arith.subf %6, %8 : vector<8x32xf32>
    %10 = tpu.iota {dimensions = array<i32: 1>} : vector<8x32xi32>
    %c16_i32 = arith.constant 16 : i32
    %11 = vector.broadcast %c16_i32 : i32 to vector<8x32xi32>
    %12 = arith.cmpi slt, %10, %11 : vector<8x32xi32>
    %cst_11 = arith.constant 0.000000e+00 : f32
    %13 = vector.broadcast %cst_11 : f32 to vector<8x32xf32>
    %14 = arith.maximumf %9, %13 : vector<8x32xf32>
    %15 = math.absf %9 : vector<8x32xf32>
    %16 = arith.select %12, %15, %14 : vector<8x32xi1>, vector<8x32xf32>
    %17 = arith.mulf %16, %16 : vector<8x32xf32>
    %c0_12 = arith.constant 0 : index
    %c0_13 = arith.constant 0 : index
    %18 = vector.load %arg6[%c0_12, %c0_13] : memref<8x32xf32, #tpu.memory_space<vmem>>, vector<8x32xf32>
    tpu.vector_store %arg6[%c0_12, %c0_13], %9 {strides = array<i32>} : memref<8x32xf32, #tpu.memory_space<vmem>>, vector<8x32xf32>,
    %c0_14 = arith.constant 0 : index
    %c0_15 = arith.constant 0 : index
    %19 = vector.load %arg7[%c0_14, %c0_15] : memref<8x32xf32, #tpu.memory_space<vmem>>, vector<8x32xf32>
    tpu.vector_store %arg7[%c0_14, %c0_15], %16 {strides = array<i32>} : memref<8x32xf32, #tpu.memory_space<vmem>>, vector<8x32xf32>,
    %cst_16 = arith.constant 1.562500e-02 : f32
    %cst_17 = arith.constant 2.343750e-02 : f32
    %20 = vector.broadcast %cst_16 : f32 to vector<8x32xf32>
    %21 = vector.broadcast %cst_17 : f32 to vector<8x32xf32>
    %22 = arith.select %12, %20, %21 : vector<8x32xi1>, vector<8x32xf32>
    %cst_18 = arith.constant dense<0.000000e+00> : vector<8xf32>
    %23 = vector.multi_reduction <add>, %17, %cst_18 [1] : vector<8x32xf32> to vector<8xf32>
    %24 = vector.shape_cast %23 : vector<8xf32> to vector<8x1xf32>
    %25 = arith.mulf %4, %4 : vector<8x32xf32>
    %26 = vector.shape_cast %25 : vector<8x32xf32> to vector<1x8x32xf32>
    %cst_19 = arith.constant dense<0.000000e+00> : vector<1xf32>
    %27 = vector.multi_reduction <add>, %26, %cst_19 [1, 2] : vector<1x8x32xf32> to vector<1xf32>
    %28 = vector.shape_cast %27 : vector<1xf32> to vector<1x1x1xf32>
    %29 = vector.extract %28[0, 0, 0] : f32 from vector<1x1x1xf32>
    %cst_20 = arith.constant 3.906250e-03 : f32
    %30 = arith.mulf %29, %cst_20 : f32
    %31 = arith.mulf %17, %22 : vector<8x32xf32>
    %32 = vector.shape_cast %31 : vector<8x32xf32> to vector<1x8x32xf32>
    %cst_21 = arith.constant dense<0.000000e+00> : vector<1xf32>
    %33 = vector.multi_reduction <add>, %32, %cst_21 [1, 2] : vector<1x8x32xf32> to vector<1xf32>
    %34 = vector.shape_cast %33 : vector<1xf32> to vector<1x1x1xf32>
    %35 = vector.extract %34[0, 0, 0] : f32 from vector<1x1x1xf32>
    %36 = vector.shape_cast %24 : vector<8x1xf32> to vector<1x8x1xf32>
    %cst_22 = arith.constant dense<0.000000e+00> : vector<1xf32>
    %37 = vector.multi_reduction <add>, %36, %cst_22 [1, 2] : vector<1x8x1xf32> to vector<1xf32>
    %38 = vector.shape_cast %37 : vector<1xf32> to vector<1x1x1xf32>
    %39 = vector.extract %38[0, 0, 0] : f32 from vector<1x1x1xf32>
    %cst_23 = arith.constant 1.250000e-01 : f32
    %40 = arith.mulf %39, %cst_23 : f32
    %41 = math.sqrt %24 : vector<8x1xf32>
    %42 = vector.shape_cast %41 : vector<8x1xf32> to vector<1x8x1xf32>
    %cst_24 = arith.constant dense<0.000000e+00> : vector<1xf32>
    %43 = vector.multi_reduction <add>, %42, %cst_24 [1, 2] : vector<1x8x1xf32> to vector<1xf32>
    %44 = vector.shape_cast %43 : vector<1xf32> to vector<1x1x1xf32>
    %45 = vector.extract %44[0, 0, 0] : f32 from vector<1x1x1xf32>
    %cst_25 = arith.constant 1.250000e-01 : f32
    %46 = arith.mulf %45, %cst_25 : f32
    %47 = arith.mulf %3, %24 : vector<8x1xf32>
    %48 = vector.shape_cast %47 : vector<8x1xf32> to vector<1x8x1xf32>
    %cst_26 = arith.constant dense<0.000000e+00> : vector<1xf32>
    %49 = vector.multi_reduction <add>, %48, %cst_26 [1, 2] : vector<1x8x1xf32> to vector<1xf32>
    %50 = vector.shape_cast %49 : vector<1xf32> to vector<1x1x1xf32>
    %51 = vector.extract %50[0, 0, 0] : f32 from vector<1x1x1xf32>
    %cst_27 = arith.constant 1.250000e-01 : f32
    %52 = arith.mulf %51, %cst_27 : f32
    %53 = arith.mulf %2, %14 : vector<8x32xf32>
    %54 = vector.shape_cast %53 : vector<8x32xf32> to vector<1x8x32xf32>
    %cst_28 = arith.constant dense<0.000000e+00> : vector<1xf32>
    %55 = vector.multi_reduction <add>, %54, %cst_28 [1, 2] : vector<1x8x32xf32> to vector<1xf32>
    %56 = vector.shape_cast %55 : vector<1xf32> to vector<1x1x1xf32>
    %57 = vector.extract %56[0, 0, 0] : f32 from vector<1x1x1xf32>
    %cst_29 = arith.constant 1.250000e-01 : f32
    %58 = arith.mulf %57, %cst_29 : f32
    %59 = vector.shape_cast %3 : vector<8x1xf32> to vector<1x8x1xf32>
    %cst_30 = arith.constant dense<0.000000e+00> : vector<1xf32>
    %60 = vector.multi_reduction <add>, %59, %cst_30 [1, 2] : vector<1x8x1xf32> to vector<1xf32>
    %61 = vector.shape_cast %60 : vector<1xf32> to vector<1x1x1xf32>
    %62 = vector.extract %61[0, 0, 0] : f32 from vector<1x1x1xf32>
    %cst_31 = arith.constant 1.250000e-01 : f32
    %63 = arith.mulf %62, %cst_31 : f32
    %c0_32 = arith.constant 0 : index
    %64 = memref.load %arg8[%c0_32] : memref<9xf32, #tpu.memory_space<smem>>
    memref.store %30, %arg8[%c0_32] : memref<9xf32, #tpu.memory_space<smem>>
    %c1 = arith.constant 1 : index
    %65 = memref.load %arg8[%c1] : memref<9xf32, #tpu.memory_space<smem>>
    memref.store %35, %arg8[%c1] : memref<9xf32, #tpu.memory_space<smem>>
    %c2 = arith.constant 2 : index
    %66 = memref.load %arg8[%c2] : memref<9xf32, #tpu.memory_space<smem>>
    memref.store %40, %arg8[%c2] : memref<9xf32, #tpu.memory_space<smem>>
    %c3 = arith.constant 3 : index
    %67 = memref.load %arg8[%c3] : memref<9xf32, #tpu.memory_space<smem>>
    memref.store %46, %arg8[%c3] : memref<9xf32, #tpu.memory_space<smem>>
    %c4 = arith.constant 4 : index
    %68 = memref.load %arg8[%c4] : memref<9xf32, #tpu.memory_space<smem>>
    memref.store %52, %arg8[%c4] : memref<9xf32, #tpu.memory_space<smem>>
    %c5 = arith.constant 5 : index
    %69 = memref.load %arg8[%c5] : memref<9xf32, #tpu.memory_space<smem>>
    memref.store %58, %arg8[%c5] : memref<9xf32, #tpu.memory_space<smem>>
    %70 = arith.addf %30, %58 : f32
    %71 = arith.addf %70, %52 : f32
    %c6 = arith.constant 6 : index
    %72 = memref.load %arg8[%c6] : memref<9xf32, #tpu.memory_space<smem>>
    memref.store %71, %arg8[%c6] : memref<9xf32, #tpu.memory_space<smem>>
    %73 = arith.addf %30, %35 : f32
    %c7 = arith.constant 7 : index
    %74 = memref.load %arg8[%c7] : memref<9xf32, #tpu.memory_space<smem>>
    memref.store %73, %arg8[%c7] : memref<9xf32, #tpu.memory_space<smem>>
    %c8 = arith.constant 8 : index
    %75 = memref.load %arg8[%c8] : memref<9xf32, #tpu.memory_space<smem>>
    memref.store %63, %arg8[%c8] : memref<9xf32, #tpu.memory_space<smem>>
    return
  }
}

</mosaic_0001>

<bundles_post_ra>
// kernel: tpu_custom_call.1
= control target key start
LH: loop header
LB: loop body
LE: loop exit
PB: predicated region body
PF: predicated region fallthrough
CT: control target
= control target key end

     0   :  { %14 = vsyncpa [#allocation3], 0  ;;  %s552_s0 = inlined_call_operand.vmem [shape: f32[8,32], index: 0, kind: input, shape index: {}]   ;;  %s553_s1 = inlined_call_operand.hbm [shape: f32[8,32], index: 1, kind: input, shape index: {}]   ;;  %s554_s2 = inlined_call_operand.hbm [shape: f32[32,32], index: 2, kind: input, shape index: {}]   ;;  %s555_s3 = inlined_call_operand.vmem [shape: f32[1,32], index: 3, kind: input, shape index: {}]   ;;  %s556_s4 = inlined_call_operand.hbm [shape: f32[8,32], index: 4, kind: input, shape index: {}]   ;;  %s557_s5 = inlined_call_operand.vmem [shape: f32[8,1], index: 5, kind: input, shape index: {}]   ;;  %s558_s6 = inlined_call_operand.hbm [shape: f32[8,32], index: 6, kind: output, shape index: {0}]   ;;  %s559_s7 = inlined_call_operand.hbm [shape: f32[8,32], index: 7, kind: output, shape index: {1}]   ;;  %s560_s8 = inlined_call_operand.hbm [shape: f32[9], index: 8, kind: output, shape index: {2}]  }
   0x1   :  { %15 = vsyncpa [#allocation7], 0 }
   0x2   :  { %16 = vsyncpa [#allocation4], 0 }
   0x3   :  { %17 = vsyncpa [#allocation11], 0  ;;  %s36_s29 = sshll.u32 %s554_s2, 4  ;;  %s37_s29 = int_to_ptr.hbm [resolvable:$true] %s36_s29 }
   0x4   :  { %18 = vsyncpa [#allocation5], 0  ;;  %s455_s30 = smov [#allocation6]   ;;  %s26_s12 = sshll.u32 %s553_s1, 4  ;;  %s27_s12 = int_to_ptr.hbm [resolvable:$true] %s26_s12 }
   0x5   :  { %s38_s9 = sshll.u32 %s455_s30, 4  ;;  %s456_s13 = smov 128   ;;  %s39_s9 = int_to_ptr.vmem [resolvable:$true] %s38_s9 }
   0x6   :  { %s457_s14 = smov 8   ;;  %s458_s15 = smov [#allocation2]  }
   0x7   :  { %44 = dma.hbm_to_vmem [thread:$0]  %s37_s29, 512, %s39_s9, [#allocation7], %s456_s13, %s456_s13, %s457_s14  }
   0x8   :  { %s28_s16 = sshll.u32 %s458_s15, 4  ;;  %s52_s19 = sshll.u32 %s556_s4, 4  ;;  %s29_s16 = int_to_ptr.vmem [resolvable:$true] %s28_s16  ;;  %s53_s19 = int_to_ptr.hbm [resolvable:$true] %s52_s19 }
   0x9   :  { %31 = dma.hbm_to_vmem [thread:$0]  %s27_s12, 128, %s29_s16, [#allocation3]  }
   0xa   :  { %s459_s2 = smov [#allocation8]  }
   0xb   :  { %s54_s20 = sshll.u32 %s459_s2, 4  ;;  %s55_s20 = int_to_ptr.vmem [resolvable:$true] %s54_s20 }
   0xc   :  { %57 = dma.hbm_to_vmem [thread:$0]  %s53_s19, 128, %s55_s20, [#allocation7]  }
   0xd   :  { %445 = dma.done.wait [#allocation3], 128  }
   0xe   :  { %446 = vsyncadd [#allocation3], 4294967168 }
   0xf   :  { %447 = dma.done.wait [#allocation7], 640  }
  0x10   :  { %448 = vsyncadd [#allocation7], 4294966656  ;;  %v80_v0 = vld [vmem:[#allocation6 + $0x18] sm:$0xff]  ;;  %v79_v1 = vld [vmem:[#allocation6 + $0x10] sm:$0xff]  ;;  %vm81_vm0 = vcmask 261120   ;;  %v110_v5 = vlaneseq  ;;  %v460_v14 = vmov 0.0234375  }
  0x11   :  { %97 = vmatpush.msra.mxu0 %v80_v0  ;;  %v78_v2 = vld [vmem:[#allocation6 + $0x8] sm:$0xff]  ;;  %v77_v3 = vld [vmem:[#allocation6] sm:$0xff]  ;;  %v72_v4 = vld [vmem:[%s552_s0] sm:$0xff]  ;;  %vm146_vm2 = vcmask 7168   ;;  %s461_s26 = smov [#allocation9]   ;;  %s244_s30 = sshll.u32 %s558_s6, 4  ;;  %s245_s30 = int_to_ptr.hbm [resolvable:$true] %s244_s30 }
  0x12   :  { %v310_v6 = vld [vmem:[%s555_s3] ss:$0 sm:$0xff]  ;;  %v111_v7 = vand.u32 127, %v110_v5  ;;  %v74_v23 = vld [vmem:[#allocation8] sm:$0xff]  ;;  %s242_s27 = sshll.u32 %s461_s26, 4  ;;  %s462_s9 = smov [#allocation10]   ;;  %s243_s27 = int_to_ptr.vmem [resolvable:$true] %s242_s27 }
  0x13   :  { %98 = vmatpush.msra.mxu0 %v79_v1  ;;  %v73_v10 = vld [vmem:[#allocation2] sm:$0xff]  ;;  %s253_s10 = sshll.u32 %s462_s9, 4  ;;  %s255_s13 = sshll.u32 %s559_s7, 4  ;;  %s254_s10 = int_to_ptr.vmem [resolvable:$true] %s253_s10  ;;  %s256_s13 = int_to_ptr.hbm [resolvable:$true] %s255_s13 }
  0x14   :  { %vm112_vm1 = vcmp.lt.s32.totalorder %v111_v7, 16  ;;  %v76_v16 = vsub.f32 %v72_v4, %v73_v10  ;;  %v75_v31 = vld [vmem:[%s557_s5] sm:$0xff]  ;;  %s264_s21 = sshll.u32 %s560_s8, 4  ;;  %s463_s3 = smov [#allocation12]   ;;  %s265_s21 = int_to_ptr.hbm [resolvable:$true] %s264_s21 }
  0x15   :  { %99 = vmatpush.msra.mxu0 %v78_v2  ;;  %v119_v15 = vsel %vm112_vm1, 0.015625, %v460_v14  ;;  %v205_v33 = vsel %vm146_vm2, %v75_v31, 0.0 }
  0x16   :  { %v123_v21 = vmul.f32 %v76_v16, %v76_v16 }
  0x17   :  { %100 = vmatpush.msra.mxu0 %v77_v3 }
  0x18   :  { %286 = vmatmul.msk.f32.vlgmr.msra.gmra.mxu0 %vm81_vm0, %v72_v4  ;;  %v124_v22 = vsel %vm81_vm0, %v123_v21, 0.0 }
  0x95   :  { %v102_v8 = vpop.f32.mrf.mxu0 }
  0x96   :  { %v109_v9 = vsub.f32 %v102_v8, %v310_v6 }
  0x98   :  { %v113_v11 = vmax.f32 %v109_v9, 0.0  ;;  %v114_v12 = vand.u32 2147483647, %v109_v9  ;;  %117 = vst.msk [vmem:[#allocation9] sm:$0xff] %vm81_vm0, %v109_v9 }
  0x99   :  { %247 = dma.vmem_to_hbm [thread:$0]  %s243_s27, 128, %s245_s30, [#allocation4]  }
  0x9a   :  { %v115_v13 = vsel %vm112_vm1, %v114_v12, %v113_v11  ;;  %v193_v24 = vmul.f32 %v113_v11, %v74_v23 }
  0x9b   :  { %v116_v17 = vmul.f32 %v115_v13, %v115_v13  ;;  %118 = vst.msk [vmem:[#allocation10] sm:$0xff] %vm81_vm0, %v115_v13 }
  0x9c   :  { %v194_v25 = vsel %vm81_vm0, %v193_v24, 0.0  ;;  %258 = dma.vmem_to_hbm [thread:$0]  %s254_s10, 128, %s256_s13, [#allocation11]  }
  0x9d   :  { %v120_v18 = vsel %vm81_vm0, %v116_v17, 0.0  ;;  %v135_v19 = vmul.f32 %v119_v15, %v116_v17 }
  0x9e   :  { %121 = vadd.xlane.f32.xlu0 %v120_v18 }
  0x9f   :  { %v136_v20 = vsel %vm81_vm0, %v135_v19, 0.0 }
  0xa0   :  { %137 = vadd.xlane.f32.xlu1 %v136_v20 }
  0xa6   :  { %125 = vadd.xlane.f32.xlu0 %v124_v22 }
  0xae   :  { %195 = vadd.xlane.f32.xlu0 %v194_v25 }
 0x111   :  { %v122_v26 = vpop.xlane.xlu0 %121 }
 0x112   :  { %311 = vrsqrt.f32 %v122_v26  ;;  %v147_v27 = vsel %vm146_vm2, %v122_v26, 0.0  ;;  %vm165_vm3 = vcmp.eq.f32.partialorder %v122_v26, inf  ;;  %v168_v50 = vand.u32 2147483648, %v122_v26 }
 0x113   :  { %v138_v28 = vpop.xlane.xlu1 %137  ;;  %148 = vadd.xlane.f32.xlu1 %v147_v27  ;;  %vm167_vm4 = vcmp.eq.f32.partialorder %v122_v26, 0.0  ;;  %v181_v55 = vmul.f32 %v122_v26, %v75_v31 }
 0x114   :  { %v139_v29 = vrot.slane %v138_v28, 4 }
 0x115   :  { %v182_v56 = vsel %vm146_vm2, %v181_v55, 0.0 }
 0x116   :  { %v140_v30 = vadd.f32 %v139_v29, %v138_v28 }
 0x118   :  { %v312_v32 = vpop.eup %311  ;;  %v141_v34 = vrot.slane %v140_v30, 2 }
 0x119   :  { %v126_v35 = vpop.xlane.xlu0 %125  ;;  %v159_v36 = vmul.f32 %v312_v32, %v122_v26 }
 0x11a   :  { %v127_v37 = vrot.slane %v126_v35, 4  ;;  %v142_v40 = vadd.f32 %v141_v34, %v140_v30 }
 0x11b   :  { %v160_v38 = vmul.f32 %v312_v32, %v159_v36  ;;  %206 = vadd.xlane.f32.xlu1 %v205_v33 }
 0x11c   :  { %v128_v39 = vadd.f32 %v127_v37, %v126_v35  ;;  %v143_v45 = vrot.slane %v142_v40, 1 }
 0x11d   :  { %v161_v41 = vmul.f32 0.5, %v160_v38 }
 0x11e   :  { %v129_v42 = vrot.slane %v128_v39, 2  ;;  %v144_v51 = vadd.f32 %v143_v45, %v142_v40 }
 0x11f   :  { %v162_v43 = vsub.f32 1.5, %v161_v41 }
 0x120   :  { %v130_v44 = vadd.f32 %v129_v42, %v128_v39 }
 0x121   :  { %v163_v46 = vmul.f32 %v312_v32, %v162_v43  ;;  %v196_v0 = vpop.xlane.xlu0 %195 }
 0x122   :  { %v131_v47 = vrot.slane %v130_v44, 1  ;;  %v197_v2 = vrot.slane %v196_v0, 4 }
 0x123   :  { %v164_v48 = vmul.f32 %v163_v46, %v122_v26 }
 0x124   :  { %v132_v49 = vadd.f32 %v131_v47, %v130_v44  ;;  %v198_v7 = vadd.f32 %v197_v2, %v196_v0 }
 0x125   :  { %v166_v52 = vsel %vm165_vm3, %v122_v26, %v164_v48 }
 0x126   :  { %287 = vpush %v132_v49  ;;  %v169_v53 = vsel %vm167_vm4, %v168_v50, %v166_v52  ;;  %v199_v11 = vrot.slane %v198_v7, 2 }
 0x127   :  { %289 = vpush %v144_v51  ;;  %v170_v54 = vsel %vm146_vm2, %v169_v53, 0.0 }
 0x128   :  { %171 = vadd.xlane.f32.xlu2 %v170_v54  ;;  %v200_v18 = vadd.f32 %v199_v11, %v198_v7 }
 0x12a   :  { %v201_v22 = vrot.slane %v200_v18, 1 }
 0x12c   :  { %v202_v26 = vadd.f32 %v201_v22, %v200_v18 }
 0x130   :  { %183 = vadd.xlane.f32.xlu2 %v182_v56 }
 0x157   :  { %s288_s5 = spop %287 }
 0x158   :  { %s538_s23 = smul.f32 0.00390625, %s288_s5  ;;  %s290_s24 = spop %289 }
 0x159   :  { %219 = sst [smem:[#allocation12 + $0x1]] %s290_s24 }
 0x15a   :  { %217 = sst [smem:[#allocation12]] %s538_s23 }
 0x15b   :  { %s232_s25 = sadd.f32 %s290_s24, %s538_s23 }
 0x15d   :  { %234 = sst [smem:[#allocation12 + $0x7]] %s232_s25 }
 0x186   :  { %v149_v57 = vpop.xlane.xlu1 %148 }
 0x187   :  { %v150_v58 = vrot.slane %v149_v57, 4 }
 0x189   :  { %v151_v59 = vadd.f32 %v150_v58, %v149_v57 }
 0x18b   :  { %v152_v60 = vrot.slane %v151_v59, 2 }
 0x18d   :  { %v153_v61 = vadd.f32 %v152_v60, %v151_v59 }
 0x18e   :  { %v207_v1 = vpop.xlane.xlu1 %206 }
 0x18f   :  { %v154_v62 = vrot.slane %v153_v61, 1  ;;  %v208_v5 = vrot.slane %v207_v1, 4 }
 0x191   :  { %v155_v63 = vadd.f32 %v154_v62, %v153_v61  ;;  %v209_v9 = vadd.f32 %v208_v5, %v207_v1 }
 0x193   :  { %291 = vpush %v155_v63  ;;  %v210_v13 = vrot.slane %v209_v9, 2 }
 0x195   :  { %v211_v19 = vadd.f32 %v210_v13, %v209_v9 }
 0x197   :  { %v212_v24 = vrot.slane %v211_v19, 1 }
 0x199   :  { %v213_v27 = vadd.f32 %v212_v24, %v211_v19 }
 0x19b   :  { %v172_v3 = vpop.xlane.xlu2 %171 }
 0x19c   :  { %v173_v4 = vrot.slane %v172_v3, 4 }
 0x19e   :  { %v174_v6 = vadd.f32 %v173_v4, %v172_v3 }
 0x1a0   :  { %v175_v8 = vrot.slane %v174_v6, 2 }
 0x1a2   :  { %v176_v10 = vadd.f32 %v175_v8, %v174_v6 }
 0x1a3   :  { %v184_v12 = vpop.xlane.xlu2 %183 }
 0x1a4   :  { %v185_v14 = vrot.slane %v184_v12, 4  ;;  %v177_v15 = vrot.slane %v176_v10, 1 }
 0x1a6   :  { %v186_v16 = vadd.f32 %v185_v14, %v184_v12  ;;  %v178_v17 = vadd.f32 %v177_v15, %v176_v10 }
 0x1a8   :  { %v187_v20 = vrot.slane %v186_v16, 2  ;;  %293 = vpush %v178_v17 }
 0x1aa   :  { %v188_v21 = vadd.f32 %v187_v20, %v186_v16 }
 0x1ac   :  { %v189_v23 = vrot.slane %v188_v21, 1 }
 0x1ae   :  { %v190_v25 = vadd.f32 %v189_v23, %v188_v21 }
 0x1b0   :  { %295 = vpush %v190_v25 }
 0x1b1   :  { %297 = vpush %v202_v26 }
 0x1b2   :  { %299 = vpush %v213_v27 }
 0x1c4   :  { %s292_s6 = spop %291 }
 0x1c5   :  { %s157_s7 = smul.f32 0.125, %s292_s6 }
 0x1c7   :  { %221 = sst [smem:[#allocation12 + $0x2]] %s157_s7 }
 0x1d9   :  { %s294_s14 = spop %293 }
 0x1da   :  { %s180_s15 = smul.f32 0.125, %s294_s14 }
 0x1dc   :  { %223 = sst [smem:[#allocation12 + $0x3]] %s180_s15 }
 0x1e1   :  { %s296_s16 = spop %295 }
 0x1e2   :  { %s192_s17 = smul.f32 0.125, %s296_s16  ;;  %s298_s18 = spop %297 }
 0x1e3   :  { %s204_s19 = smul.f32 0.125, %s298_s18  ;;  %s300_s2 = spop %299 }
 0x1e4   :  { %225 = sst [smem:[#allocation12 + $0x4]] %s192_s17  ;;  %s215_s20 = smul.f32 0.125, %s300_s2 }
 0x1e5   :  { %227 = sst [smem:[#allocation12 + $0x5]] %s204_s19 }
 0x1e6   :  { %s228_s22 = sadd.f32 %s204_s19, %s538_s23 }
 0x1e7   :  { %236 = sst [smem:[#allocation12 + $0x8]] %s215_s20 }
 0x1e8   :  { %s229_s0 = sadd.f32 %s228_s22, %s192_s17 }
 0x1ea   :  { %231 = sst [smem:[#allocation12 + $0x6]] %s229_s0 }
 0x1eb   :  { %267 = dma.smem_to_hbm %s463_s3, 16, %s265_s21, [#allocation5]  }
 0x1ec   :  { %449 = dma.done.wait [#allocation4], 128  }
 0x1ed   :  { %450 = vsyncadd [#allocation4], 4294967168 }
 0x1ee   :  { %451 = dma.done.wait [#allocation11], 128  }
 0x1ef   :  { %452 = vsyncadd [#allocation11], 4294967168 }
 0x1f0   :  { %453 = dma.done.wait [#allocation5], 16  }
 0x1f1   :  { %454 = vsyncadd [#allocation5], 4294967280 }
 0x1f2   :  { %280 = sfence }
 0x1f3   :  { %281 = vsyncpa [#allocation3], 1 }
 0x1f4   :  { %282 = vsyncpa [#allocation7], 1 }
 0x1f5   :  { %283 = vsyncpa [#allocation4], 1 }
 0x1f6   :  { %284 = vsyncpa [#allocation11], 1 }
 0x1f7   :  { %285 = vsyncpa [#allocation5], 1 }

</bundles_post_ra>
